<compile_context>
chip_gen: v7x
topology: tpu7x:2x2x1
jax: 0.10.0
libtpu: 0.0.40
codegen_flags: <defaults>
</compile_context>

<pallas_src>
import math
import jax
import jax.numpy as jnp
from jax import lax
from jax.experimental import pallas as pl
from jax.experimental.pallas import tpu as pltpu

# --- model config (small, consistent with the module's __init__) ---
B = 2           # batch of sequences processed per pallas_call (grid axis)
S = 8           # sequence length
E = 32          # d_model
NHEAD = 4
HEAD_DIM = E // NHEAD
FF = 64         # dim_feedforward
EPS = 1e-5      # nn.LayerNorm default eps


def transformer_layer_kernel(x_ref, bias_ref, wqkv_ref, wo_ref,
                             w1_ref, b1_ref, w2_ref, affine_ref, out_ref):
    x = x_ref[...].astype(jnp.float32)        # (S, E)
    mask_bias = bias_ref[...]                 # (S, S), -1e30 where masked, else 0

    # ---- fused QKV projection (weight pre-transposed+fused on host: (E, 3E)) ----
    qkv = jnp.dot(x, wqkv_ref[...], preferred_element_type=jnp.float32)  # (S, 3E)

    def heads(base):
        # gather the per-head (S, D) lane slices into a (H, S, D) stack
        return jnp.stack(
            [qkv[:, base + h * HEAD_DIM: base + (h + 1) * HEAD_DIM]
             for h in range(NHEAD)], axis=0)

    qh = heads(0)          # (H, S, D)
    kh = heads(E)          # (H, S, D)
    vh = heads(2 * E)      # (H, S, D)

    scaling = jnp.float32(float(HEAD_DIM) ** -0.5)

    # ---- batched per-head scaled dot-product attention ----
    sc = jnp.einsum('hsd,htd->hst', qh, kh,
                    preferred_element_type=jnp.float32) * scaling        # (H, S, S)
    sc = sc + mask_bias[None, :, :]                                      # additive mask
    m = jnp.max(sc, axis=-1, keepdims=True)
    e = jnp.exp(sc - m)
    denom = jnp.sum(e, axis=-1, keepdims=True)
    p = e * pl.reciprocal(denom, approx=True)                            # softmax
    # TODO(synk): F.dropout on attention probs is identity (inference mode).
    attn3 = jnp.einsum('hst,htd->hsd', p, vh,
                       preferred_element_type=jnp.float32)               # (H, S, D)
    attn = jnp.concatenate([attn3[h] for h in range(NHEAD)], axis=-1)    # (S, E)
    attn = jnp.dot(attn, wo_ref[...], preferred_element_type=jnp.float32)

    # ---- unpack small packed per-channel params ----
    aff = affine_ref[...]                     # (8, E)
    g1, be1 = aff[0:1, :], aff[1:2, :]
    g2, be2 = aff[2:3, :], aff[3:4, :]
    b2 = aff[4:5, :]

    # ---- residual + LayerNorm 1 ----
    ss = x + attn
    mu = jnp.mean(ss, axis=-1, keepdims=True)
    var = jnp.mean((ss - mu) ** 2, axis=-1, keepdims=True)
    ss = (ss - mu) * lax.rsqrt(var + EPS) * g1 + be1

    # ---- feed-forward: linear2(relu(linear1(ss))) ----
    h1 = jnp.dot(ss, w1_ref[...], preferred_element_type=jnp.float32) + b1_ref[...]
    h1 = jnp.maximum(h1, 0.0)
    h2 = jnp.dot(h1, w2_ref[...], preferred_element_type=jnp.float32) + b2

    # ---- residual + LayerNorm 2 ----
    ss2 = ss + h2
    mu2 = jnp.mean(ss2, axis=-1, keepdims=True)
    var2 = jnp.mean((ss2 - mu2) ** 2, axis=-1, keepdims=True)
    out = (ss2 - mu2) * lax.rsqrt(var2 + EPS) * g2 + be2

    out_ref[...] = out.astype(out_ref.dtype)


def prepare_params(p):
    """Host-side (one-time) weight transforms: transpose, fuse QKV, pack small params."""
    wqkv = jnp.concatenate([p["wq"].T, p["wk"].T, p["wv"].T], axis=1)   # (E, 3E)
    wo_t = p["wo"].T                                                    # (E, E)
    w1_t = p["w1"].T                                                    # (E, FF)
    w2_t = p["w2"].T                                                    # (FF, E)
    b1 = p["b1"].reshape(1, FF)
    affine = jnp.zeros((8, E), jnp.float32)
    affine = affine.at[0].set(p["g1"].reshape(E))
    affine = affine.at[1].set(p["be1"].reshape(E))
    affine = affine.at[2].set(p["g2"].reshape(E))
    affine = affine.at[3].set(p["be2"].reshape(E))
    affine = affine.at[4].set(p["b2"].reshape(E))
    return wqkv, wo_t, w1_t, b1, w2_t, affine


def transformer_layer(src, mask_bias, params):
    """src: (B, S, E) float32; mask_bias: (S, S) float32 additive mask (-1e30 == masked)."""
    wqkv, wo_t, w1_t, b1, w2_t, affine = prepare_params(params)
    batch = src.shape[0]

    def full_spec(a):
        return pl.BlockSpec(a.shape, lambda b, _nd=a.ndim: (0,) * _nd)

    return pl.pallas_call(
        transformer_layer_kernel,
        out_shape=jax.ShapeDtypeStruct((batch, S, E), jnp.float32),
        grid=(batch,),
        in_specs=[
            pl.BlockSpec((None, S, E), lambda b: (b, 0, 0)),   # src (one sequence per step)
            full_spec(mask_bias),
            full_spec(wqkv),
            full_spec(wo_t),
            full_spec(w1_t),
            full_spec(b1),
            full_spec(w2_t),
            full_spec(affine),
        ],
        out_specs=pl.BlockSpec((None, S, E), lambda b: (b, 0, 0)),
        compiler_params=pltpu.CompilerParams(
            dimension_semantics=("parallel",)),                # shard batch across TCs (v7x)
    )(src, mask_bias, wqkv, wo_t, w1_t, b1, w2_t, affine)


def _xavier_uniform(key, shape):
    fan_out, fan_in = shape
    a = math.sqrt(6.0 / (fan_in + fan_out))
    return jax.random.uniform(key, shape, jnp.float32, -a, a)


def init_params(key):
    ks = jax.random.split(key, 8)
    return {
        # attention projections (PyTorch layout: (out, in), as in nn.Linear / F.linear)
        "wq": _xavier_uniform(ks[0], (E, E)),
        "wk": _xavier_uniform(ks[1], (E, E)),
        "wv": _xavier_uniform(ks[2], (E, E)),
        "wo": _xavier_uniform(ks[3], (E, E)),
        # feed-forward
        "w1": _xavier_uniform(ks[4], (FF, E)),
        "b1": jax.random.uniform(ks[5], (1, FF), jnp.float32, -0.1, 0.1),
        "w2": _xavier_uniform(ks[6], (E, FF)),
        "b2": jax.random.uniform(ks[7], (1, E), jnp.float32, -0.1, 0.1),
        # layer norms (PyTorch default init: weight=1, bias=0)
        "g1": jnp.ones((1, E), jnp.float32),
        "be1": jnp.zeros((1, E), jnp.float32),
        "g2": jnp.ones((1, E), jnp.float32),
        "be2": jnp.zeros((1, E), jnp.float32),
    }


if __name__ == "__main__":
    key = jax.random.PRNGKey(0)
    k_x, k_p = jax.random.split(key)

    src = jax.random.normal(k_x, (B, S, E), jnp.float32)

    # causal mask: True above the diagonal -> additive bias of -1e30 (== masked_fill)
    row = jnp.arange(S)[:, None]
    col = jnp.arange(S)[None, :]
    mask_bias = jnp.where(col > row, jnp.float32(-1e30), jnp.float32(0.0))  # (S, S)

    params = init_params(k_p)

    out = transformer_layer(src, mask_bias, params)
    out = jax.block_until_ready(out)
    assert out.shape == (B, S, E)
    assert bool(jnp.all(jnp.isfinite(out)))
    print("KERNEL_OK")
</pallas_src>

<mosaic_0001>
module attributes {stable_mosaic.version = 11 : i64} {
  func.func @transformer_layer_kernel(%arg0: i32, %arg1: memref<1x8x32xf32, #tpu.memory_space<vmem>>, %arg2: memref<8x8xf32, #tpu.memory_space<vmem>>, %arg3: memref<32x96xf32, #tpu.memory_space<vmem>>, %arg4: memref<32x32xf32, #tpu.memory_space<vmem>>, %arg5: memref<32x64xf32, #tpu.memory_space<vmem>>, %arg6: memref<1x64xf32, #tpu.memory_space<vmem>>, %arg7: memref<64x32xf32, #tpu.memory_space<vmem>>, %arg8: memref<8x32xf32, #tpu.memory_space<vmem>>, %arg9: memref<1x8x32xf32, #tpu.memory_space<vmem>>) attributes {dimension_semantics = [#tpu.dimension_semantics<parallel>], iteration_bounds = array<i64: 2>, scalar_prefetch = 0 : i64, scratch_operands = 0 : i64, tpu.core_type = #tpu.core_type<tc>, window_params = [{transform_indices = @transform_0, window_bounds = array<i64: 1, 8, 32>}, {pipeline_mode = #tpu.pipeline_mode<synchronous>, transform_indices = @transform_1, window_bounds = array<i64: 8, 8>}, {pipeline_mode = #tpu.pipeline_mode<synchronous>, transform_indices = @transform_2, window_bounds = array<i64: 32, 96>}, {pipeline_mode = #tpu.pipeline_mode<synchronous>, transform_indices = @transform_3, window_bounds = array<i64: 32, 32>}, {pipeline_mode = #tpu.pipeline_mode<synchronous>, transform_indices = @transform_4, window_bounds = array<i64: 32, 64>}, {pipeline_mode = #tpu.pipeline_mode<synchronous>, transform_indices = @transform_5, window_bounds = array<i64: 1, 64>}, {pipeline_mode = #tpu.pipeline_mode<synchronous>, transform_indices = @transform_6, window_bounds = array<i64: 64, 32>}, {pipeline_mode = #tpu.pipeline_mode<synchronous>, transform_indices = @transform_7, window_bounds = array<i64: 8, 32>}, {transform_indices = @transform_8, window_bounds = array<i64: 1, 8, 32>}]} {
    %c0 = arith.constant 0 : index
    %c0_0 = arith.constant 0 : index
    %c0_1 = arith.constant 0 : index
    %0 = vector.load %arg1[%c0, %c0_0, %c0_1] : memref<1x8x32xf32, #tpu.memory_space<vmem>>, vector<1x8x32xf32>
    %1 = vector.shape_cast %0 : vector<1x8x32xf32> to vector<8x32xf32>
    %c0_2 = arith.constant 0 : index
    %c0_3 = arith.constant 0 : index
    %2 = vector.load %arg2[%c0_2, %c0_3] : memref<8x8xf32, #tpu.memory_space<vmem>>, vector<8x8xf32>
    %c0_4 = arith.constant 0 : index
    %c0_5 = arith.constant 0 : index
    %3 = vector.load %arg3[%c0_4, %c0_5] : memref<32x96xf32, #tpu.memory_space<vmem>>, vector<32x96xf32>
    %cst = arith.constant dense<0.000000e+00> : vector<8x96xf32>
    %4 = tpu.matmul %1, %3, %cst {dimension_numbers = #tpu.dot_dimension_numbers<[1], [0], [0], [1], [0, 0, 1, 1], [], []>} : vector<8x32xf32>, vector<32x96xf32>, vector<8x96xf32> -> vector<8x96xf32>
    %5 = vector.extract_strided_slice %4 {offsets = [0, 0], sizes = [8, 8], strides = [1, 1]} : vector<8x96xf32> to vector<8x8xf32>
    %6 = vector.extract_strided_slice %4 {offsets = [0, 8], sizes = [8, 8], strides = [1, 1]} : vector<8x96xf32> to vector<8x8xf32>
    %7 = vector.extract_strided_slice %4 {offsets = [0, 16], sizes = [8, 8], strides = [1, 1]} : vector<8x96xf32> to vector<8x8xf32>
    %8 = vector.extract_strided_slice %4 {offsets = [0, 24], sizes = [8, 8], strides = [1, 1]} : vector<8x96xf32> to vector<8x8xf32>
    %9 = vector.shape_cast %5 : vector<8x8xf32> to vector<1x8x8xf32>
    %10 = vector.shape_cast %6 : vector<8x8xf32> to vector<1x8x8xf32>
    %11 = vector.shape_cast %7 : vector<8x8xf32> to vector<1x8x8xf32>
    %12 = vector.shape_cast %8 : vector<8x8xf32> to vector<1x8x8xf32>
    %13 = tpu.concatenate %9, %10, %11, %12 in 0 : vector<1x8x8xf32>, vector<1x8x8xf32>, vector<1x8x8xf32>, vector<1x8x8xf32> -> vector<4x8x8xf32>
    %14 = vector.extract_strided_slice %4 {offsets = [0, 32], sizes = [8, 8], strides = [1, 1]} : vector<8x96xf32> to vector<8x8xf32>
    %15 = vector.extract_strided_slice %4 {offsets = [0, 40], sizes = [8, 8], strides = [1, 1]} : vector<8x96xf32> to vector<8x8xf32>
    %16 = vector.extract_strided_slice %4 {offsets = [0, 48], sizes = [8, 8], strides = [1, 1]} : vector<8x96xf32> to vector<8x8xf32>
    %17 = vector.extract_strided_slice %4 {offsets = [0, 56], sizes = [8, 8], strides = [1, 1]} : vector<8x96xf32> to vector<8x8xf32>
    %18 = vector.shape_cast %14 : vector<8x8xf32> to vector<1x8x8xf32>
    %19 = vector.shape_cast %15 : vector<8x8xf32> to vector<1x8x8xf32>
    %20 = vector.shape_cast %16 : vector<8x8xf32> to vector<1x8x8xf32>
    %21 = vector.shape_cast %17 : vector<8x8xf32> to vector<1x8x8xf32>
    %22 = tpu.concatenate %18, %19, %20, %21 in 0 : vector<1x8x8xf32>, vector<1x8x8xf32>, vector<1x8x8xf32>, vector<1x8x8xf32> -> vector<4x8x8xf32>
    %23 = vector.extract_strided_slice %4 {offsets = [0, 64], sizes = [8, 8], strides = [1, 1]} : vector<8x96xf32> to vector<8x8xf32>
    %24 = vector.extract_strided_slice %4 {offsets = [0, 72], sizes = [8, 8], strides = [1, 1]} : vector<8x96xf32> to vector<8x8xf32>
    %25 = vector.extract_strided_slice %4 {offsets = [0, 80], sizes = [8, 8], strides = [1, 1]} : vector<8x96xf32> to vector<8x8xf32>
    %26 = vector.extract_strided_slice %4 {offsets = [0, 88], sizes = [8, 8], strides = [1, 1]} : vector<8x96xf32> to vector<8x8xf32>
    %27 = vector.shape_cast %23 : vector<8x8xf32> to vector<1x8x8xf32>
    %28 = vector.shape_cast %24 : vector<8x8xf32> to vector<1x8x8xf32>
    %29 = vector.shape_cast %25 : vector<8x8xf32> to vector<1x8x8xf32>
    %30 = vector.shape_cast %26 : vector<8x8xf32> to vector<1x8x8xf32>
    %31 = tpu.concatenate %27, %28, %29, %30 in 0 : vector<1x8x8xf32>, vector<1x8x8xf32>, vector<1x8x8xf32>, vector<1x8x8xf32> -> vector<4x8x8xf32>
    "tpu.trace_start"() <{level = 10 : i32, message = "hsd,htd->hst"}> : () -> ()
    %cst_6 = arith.constant dense<0.000000e+00> : vector<4x8x8xf32>
    %32 = tpu.matmul %13, %22, %cst_6 {dimension_numbers = #tpu.dot_dimension_numbers<[2], [2], [1], [1], [0, 0, 0, 1, 1, 1], [0], [0]>} : vector<4x8x8xf32>, vector<4x8x8xf32>, vector<4x8x8xf32> -> vector<4x8x8xf32>
    "tpu.trace_stop"() : () -> ()
    %cst_7 = arith.constant 0.353553385 : f32
    %33 = vector.broadcast %cst_7 : f32 to vector<4x8x8xf32>
    %34 = arith.mulf %32, %33 : vector<4x8x8xf32>
    %35 = vector.shape_cast %2 : vector<8x8xf32> to vector<1x8x8xf32>
    %36 = vector.broadcast %35 : vector<1x8x8xf32> to vector<4x8x8xf32>
    %37 = arith.addf %34, %36 : vector<4x8x8xf32>
    %cst_8 = arith.constant dense<0xFF800000> : vector<4x8xf32>
    %38 = vector.multi_reduction <maximumf>, %37, %cst_8 [2] : vector<4x8x8xf32> to vector<4x8xf32>
    %39 = vector.shape_cast %38 : vector<4x8xf32> to vector<4x8x1xf32>
    %40 = vector.broadcast %39 : vector<4x8x1xf32> to vector<4x8x8xf32>
    %41 = arith.subf %37, %40 : vector<4x8x8xf32>
    %42 = math.exp %41 : vector<4x8x8xf32>
    %cst_9 = arith.constant dense<0.000000e+00> : vector<4x8xf32>
    %43 = vector.multi_reduction <add>, %42, %cst_9 [2] : vector<4x8x8xf32> to vector<4x8xf32>
    %44 = vector.shape_cast %43 : vector<4x8xf32> to vector<4x8x1xf32>
    %45 = tpu.reciprocal %44 {approx = true} : vector<4x8x1xf32> -> vector<4x8x1xf32>
    %46 = vector.broadcast %45 : vector<4x8x1xf32> to vector<4x8x8xf32>
    %47 = arith.mulf %42, %46 : vector<4x8x8xf32>
    "tpu.trace_start"() <{level = 10 : i32, message = "hst,htd->hsd"}> : () -> ()
    %cst_10 = arith.constant dense<0.000000e+00> : vector<4x8x8xf32>
    %48 = tpu.matmul %47, %31, %cst_10 {dimension_numbers = #tpu.dot_dimension_numbers<[2], [1], [1], [2], [0, 0, 0, 1, 1, 2], [0], [0]>} : vector<4x8x8xf32>, vector<4x8x8xf32>, vector<4x8x8xf32> -> vector<4x8x8xf32>
    "tpu.trace_stop"() : () -> ()
    %49 = vector.extract_strided_slice %48 {offsets = [0, 0, 0], sizes = [1, 8, 8], strides = [1, 1, 1]} : vector<4x8x8xf32> to vector<1x8x8xf32>
    %50 = vector.shape_cast %49 : vector<1x8x8xf32> to vector<8x8xf32>
    %51 = vector.extract_strided_slice %48 {offsets = [1, 0, 0], sizes = [1, 8, 8], strides = [1, 1, 1]} : vector<4x8x8xf32> to vector<1x8x8xf32>
    %52 = vector.shape_cast %51 : vector<1x8x8xf32> to vector<8x8xf32>
    %53 = vector.extract_strided_slice %48 {offsets = [2, 0, 0], sizes = [1, 8, 8], strides = [1, 1, 1]} : vector<4x8x8xf32> to vector<1x8x8xf32>
    %54 = vector.shape_cast %53 : vector<1x8x8xf32> to vector<8x8xf32>
    %55 = vector.extract_strided_slice %48 {offsets = [3, 0, 0], sizes = [1, 8, 8], strides = [1, 1, 1]} : vector<4x8x8xf32> to vector<1x8x8xf32>
    %56 = vector.shape_cast %55 : vector<1x8x8xf32> to vector<8x8xf32>
    %57 = tpu.concatenate %50, %52, %54, %56 in 1 : vector<8x8xf32>, vector<8x8xf32>, vector<8x8xf32>, vector<8x8xf32> -> vector<8x32xf32>
    %c0_11 = arith.constant 0 : index
    %c0_12 = arith.constant 0 : index
    %58 = vector.load %arg4[%c0_11, %c0_12] : memref<32x32xf32, #tpu.memory_space<vmem>>, vector<32x32xf32>
    %cst_13 = arith.constant dense<0.000000e+00> : vector<8x32xf32>
    %59 = tpu.matmul %57, %58, %cst_13 {dimension_numbers = #tpu.dot_dimension_numbers<[1], [0], [0], [1], [0, 0, 1, 1], [], []>} : vector<8x32xf32>, vector<32x32xf32>, vector<8x32xf32> -> vector<8x32xf32>
    %c0_14 = arith.constant 0 : index
    %c0_15 = arith.constant 0 : index
    %60 = vector.load %arg8[%c0_14, %c0_15] : memref<8x32xf32, #tpu.memory_space<vmem>>, vector<8x32xf32>
    %61 = vector.extract_strided_slice %60 {offsets = [0, 0], sizes = [1, 32], strides = [1, 1]} : vector<8x32xf32> to vector<1x32xf32>
    %62 = vector.extract_strided_slice %60 {offsets = [1, 0], sizes = [1, 32], strides = [1, 1]} : vector<8x32xf32> to vector<1x32xf32>
    %63 = vector.extract_strided_slice %60 {offsets = [2, 0], sizes = [1, 32], strides = [1, 1]} : vector<8x32xf32> to vector<1x32xf32>
    %64 = vector.extract_strided_slice %60 {offsets = [3, 0], sizes = [1, 32], strides = [1, 1]} : vector<8x32xf32> to vector<1x32xf32>
    %65 = vector.extract_strided_slice %60 {offsets = [4, 0], sizes = [1, 32], strides = [1, 1]} : vector<8x32xf32> to vector<1x32xf32>
    %66 = arith.addf %1, %59 : vector<8x32xf32>
    %cst_16 = arith.constant dense<0.000000e+00> : vector<8xf32>
    %67 = vector.multi_reduction <add>, %66, %cst_16 [1] : vector<8x32xf32> to vector<8xf32>
    %68 = vector.shape_cast %67 : vector<8xf32> to vector<8x1xf32>
    %cst_17 = arith.constant 3.200000e+01 : f32
    %69 = vector.broadcast %cst_17 : f32 to vector<8x1xf32>
    %70 = arith.divf %68, %69 : vector<8x1xf32>
    %71 = vector.broadcast %70 : vector<8x1xf32> to vector<8x32xf32>
    %72 = arith.subf %66, %71 : vector<8x32xf32>
    %73 = arith.mulf %72, %72 : vector<8x32xf32>
    %cst_18 = arith.constant dense<0.000000e+00> : vector<8xf32>
    %74 = vector.multi_reduction <add>, %73, %cst_18 [1] : vector<8x32xf32> to vector<8xf32>
    %75 = vector.shape_cast %74 : vector<8xf32> to vector<8x1xf32>
    %cst_19 = arith.constant 3.200000e+01 : f32
    %76 = vector.broadcast %cst_19 : f32 to vector<8x1xf32>
    %77 = arith.divf %75, %76 : vector<8x1xf32>
    %78 = vector.broadcast %70 : vector<8x1xf32> to vector<8x32xf32>
    %79 = arith.subf %66, %78 : vector<8x32xf32>
    %cst_20 = arith.constant 9.99999974E-6 : f32
    %80 = vector.broadcast %cst_20 : f32 to vector<8x1xf32>
    %81 = arith.addf %77, %80 : vector<8x1xf32>
    %82 = math.rsqrt %81 : vector<8x1xf32>
    %83 = vector.broadcast %82 : vector<8x1xf32> to vector<8x32xf32>
    %84 = arith.mulf %79, %83 : vector<8x32xf32>
    %85 = vector.broadcast %61 : vector<1x32xf32> to vector<8x32xf32>
    %86 = arith.mulf %84, %85 : vector<8x32xf32>
    %87 = vector.broadcast %62 : vector<1x32xf32> to vector<8x32xf32>
    %88 = arith.addf %86, %87 : vector<8x32xf32>
    %c0_21 = arith.constant 0 : index
    %c0_22 = arith.constant 0 : index
    %89 = vector.load %arg5[%c0_21, %c0_22] : memref<32x64xf32, #tpu.memory_space<vmem>>, vector<32x64xf32>
    %cst_23 = arith.constant dense<0.000000e+00> : vector<8x64xf32>
    %90 = tpu.matmul %88, %89, %cst_23 {dimension_numbers = #tpu.dot_dimension_numbers<[1], [0], [0], [1], [0, 0, 1, 1], [], []>} : vector<8x32xf32>, vector<32x64xf32>, vector<8x64xf32> -> vector<8x64xf32>
    %c0_24 = arith.constant 0 : index
    %c0_25 = arith.constant 0 : index
    %91 = vector.load %arg6[%c0_24, %c0_25] : memref<1x64xf32, #tpu.memory_space<vmem>>, vector<1x64xf32>
    %92 = vector.broadcast %91 : vector<1x64xf32> to vector<8x64xf32>
    %93 = arith.addf %90, %92 : vector<8x64xf32>
    %cst_26 = arith.constant 0.000000e+00 : f32
    %94 = vector.broadcast %cst_26 : f32 to vector<8x64xf32>
    %95 = arith.maximumf %93, %94 : vector<8x64xf32>
    %c0_27 = arith.constant 0 : index
    %c0_28 = arith.constant 0 : index
    %96 = vector.load %arg7[%c0_27, %c0_28] : memref<64x32xf32, #tpu.memory_space<vmem>>, vector<64x32xf32>
    %cst_29 = arith.constant dense<0.000000e+00> : vector<8x32xf32>
    %97 = tpu.matmul %95, %96, %cst_29 {dimension_numbers = #tpu.dot_dimension_numbers<[1], [0], [0], [1], [0, 0, 1, 1], [], []>} : vector<8x64xf32>, vector<64x32xf32>, vector<8x32xf32> -> vector<8x32xf32>
    %98 = vector.broadcast %65 : vector<1x32xf32> to vector<8x32xf32>
    %99 = arith.addf %97, %98 : vector<8x32xf32>
    %100 = arith.addf %88, %99 : vector<8x32xf32>
    %cst_30 = arith.constant dense<0.000000e+00> : vector<8xf32>
    %101 = vector.multi_reduction <add>, %100, %cst_30 [1] : vector<8x32xf32> to vector<8xf32>
    %102 = vector.shape_cast %101 : vector<8xf32> to vector<8x1xf32>
    %cst_31 = arith.constant 3.200000e+01 : f32
    %103 = vector.broadcast %cst_31 : f32 to vector<8x1xf32>
    %104 = arith.divf %102, %103 : vector<8x1xf32>
    %105 = vector.broadcast %104 : vector<8x1xf32> to vector<8x32xf32>
    %106 = arith.subf %100, %105 : vector<8x32xf32>
    %107 = arith.mulf %106, %106 : vector<8x32xf32>
    %cst_32 = arith.constant dense<0.000000e+00> : vector<8xf32>
    %108 = vector.multi_reduction <add>, %107, %cst_32 [1] : vector<8x32xf32> to vector<8xf32>
    %109 = vector.shape_cast %108 : vector<8xf32> to vector<8x1xf32>
    %cst_33 = arith.constant 3.200000e+01 : f32
    %110 = vector.broadcast %cst_33 : f32 to vector<8x1xf32>
    %111 = arith.divf %109, %110 : vector<8x1xf32>
    %112 = vector.broadcast %104 : vector<8x1xf32> to vector<8x32xf32>
    %113 = arith.subf %100, %112 : vector<8x32xf32>
    %cst_34 = arith.constant 9.99999974E-6 : f32
    %114 = vector.broadcast %cst_34 : f32 to vector<8x1xf32>
    %115 = arith.addf %111, %114 : vector<8x1xf32>
    %116 = math.rsqrt %115 : vector<8x1xf32>
    %117 = vector.broadcast %116 : vector<8x1xf32> to vector<8x32xf32>
    %118 = arith.mulf %113, %117 : vector<8x32xf32>
    %119 = vector.broadcast %63 : vector<1x32xf32> to vector<8x32xf32>
    %120 = arith.mulf %118, %119 : vector<8x32xf32>
    %121 = vector.broadcast %64 : vector<1x32xf32> to vector<8x32xf32>
    %122 = arith.addf %120, %121 : vector<8x32xf32>
    %c0_35 = arith.constant 0 : index
    %c0_36 = arith.constant 0 : index
    %c0_37 = arith.constant 0 : index
    %123 = vector.load %arg9[%c0_35, %c0_36, %c0_37] : memref<1x8x32xf32, #tpu.memory_space<vmem>>, vector<1x8x32xf32>
    %124 = vector.shape_cast %123 : vector<1x8x32xf32> to vector<8x32xf32>
    %125 = vector.shape_cast %122 : vector<8x32xf32> to vector<1x8x32xf32>
    tpu.vector_store %arg9[%c0_35, %c0_36, %c0_37], %125 {strides = array<i32>} : memref<1x8x32xf32, #tpu.memory_space<vmem>>, vector<1x8x32xf32>,
    return
  }
  func.func @transform_0(%arg0: i32) -> (i32, i32, i32) {
    %c0_i32 = arith.constant 0 : i32
    %c0_i32_0 = arith.constant 0 : i32
    %c0_i32_1 = arith.constant 0 : i32
    return %arg0, %c0_i32, %c0_i32_0 : i32, i32, i32
  }
  func.func @transform_1(%arg0: i32) -> (i32, i32) {
    %c0_i32 = arith.constant 0 : i32
    %c0_i32_0 = arith.constant 0 : i32
    %c0_i32_1 = arith.constant 0 : i32
    return %c0_i32, %c0_i32_0 : i32, i32
  }
  func.func @transform_2(%arg0: i32) -> (i32, i32) {
    %c0_i32 = arith.constant 0 : i32
    %c0_i32_0 = arith.constant 0 : i32
    %c0_i32_1 = arith.constant 0 : i32
    return %c0_i32, %c0_i32_0 : i32, i32
  }
  func.func @transform_3(%arg0: i32) -> (i32, i32) {
    %c0_i32 = arith.constant 0 : i32
    %c0_i32_0 = arith.constant 0 : i32
    %c0_i32_1 = arith.constant 0 : i32
    return %c0_i32, %c0_i32_0 : i32, i32
  }
  func.func @transform_4(%arg0: i32) -> (i32, i32) {
    %c0_i32 = arith.constant 0 : i32
    %c0_i32_0 = arith.constant 0 : i32
    %c0_i32_1 = arith.constant 0 : i32
    return %c0_i32, %c0_i32_0 : i32, i32
  }
  func.func @transform_5(%arg0: i32) -> (i32, i32) {
    %c0_i32 = arith.constant 0 : i32
    %c0_i32_0 = arith.constant 0 : i32
    %c0_i32_1 = arith.constant 0 : i32
    return %c0_i32, %c0_i32_0 : i32, i32
  }
  func.func @transform_6(%arg0: i32) -> (i32, i32) {
    %c0_i32 = arith.constant 0 : i32
    %c0_i32_0 = arith.constant 0 : i32
    %c0_i32_1 = arith.constant 0 : i32
    return %c0_i32, %c0_i32_0 : i32, i32
  }
  func.func @transform_7(%arg0: i32) -> (i32, i32) {
    %c0_i32 = arith.constant 0 : i32
    %c0_i32_0 = arith.constant 0 : i32
    %c0_i32_1 = arith.constant 0 : i32
    return %c0_i32, %c0_i32_0 : i32, i32
  }
  func.func @transform_8(%arg0: i32) -> (i32, i32, i32) {
    %c0_i32 = arith.constant 0 : i32
    %c0_i32_0 = arith.constant 0 : i32
    %c0_i32_1 = arith.constant 0 : i32
    return %arg0, %c0_i32, %c0_i32_0 : i32, i32, i32
  }
}

</mosaic_0001>

<bundles_post_ra>
// kernel: tpu_custom_call.1
= control target key start
LH: loop header
LB: loop body
LE: loop exit
PB: predicated region body
PF: predicated region fallthrough
CT: control target
= control target key end

     0   :  { %13 = vsyncpa [#allocation3], 0  ;;  %s2330_s0 = inlined_call_operand.hbm [shape: f32[2,8,32], index: 0, kind: input, shape index: {}]   ;;  %s2331_s1 = inlined_call_operand.hbm [shape: f32[8,8], index: 1, kind: input, shape index: {}]   ;;  %s2332_s2 = inlined_call_operand.vmem [shape: f32[32,96], index: 2, kind: input, shape index: {}]   ;;  %s2333_s3 = inlined_call_operand.vmem [shape: f32[32,32], index: 3, kind: input, shape index: {}]   ;;  %s2334_s4 = inlined_call_operand.vmem [shape: f32[32,64], index: 4, kind: input, shape index: {}]   ;;  %s2335_s5 = inlined_call_operand.vmem [shape: f32[1,64], index: 5, kind: input, shape index: {}]   ;;  %s2336_s6 = inlined_call_operand.vmem [shape: f32[64,32], index: 6, kind: input, shape index: {}]   ;;  %s2337_s7 = inlined_call_operand.vmem [shape: f32[8,32], index: 7, kind: input, shape index: {}]   ;;  %s2338_s8 = inlined_call_operand.hbm [shape: f32[2,8,32], index: 8, kind: output, shape index: {}]  }
   0x1   :  { %15 = vsyncpa [#allocation3 + $0x1], 0 }
   0x2   :  { %16 = vsyncpa [#allocation6], 0 }
   0x3   :  { %17 = vsyncpa [#allocation4], 0 }
   0x4   :  { %19 = vsyncpa [#allocation4 + $0x1], 0  ;;  %s1962_s27 = smov 0   ;;  %s1964_s28 = smov 0  }
   0x5   :  { %s1966_s29 = smov 0   ;;  %s1968_s30 = smov 0  }
   0x6 LB: > { %s1983_s9 = sadd.s32 4294967295, %s1901_s30   ;;  %s1492_s10 = sadd.s32 4294967294, %s1901_s30   ;;  %s1901_s30 = sphi %s1968_s30, %s2362_s30   ;;  %s1897_s29 = sphi %s1966_s29, %s2361_s29   ;;  %s1893_s28 = sphi %s1964_s28, %s2360_s28   ;;  %s1889_s27 = sphi %s1962_s27, %s2359_s27  }
   0x7   : > { %p45_p0 = scmp.ne.s32.totalorder %s1893_s28, %s1889_s27  ;;  %p2339_p1 = scmp.eq.s32.totalorder %s1983_s9, 0 }
   0x8   : > { %p222_p3 = scmp.eq.s32.totalorder %s1492_s10, 1  ;;  %p1493_p5 = scmp.ge.s32.totalorder %s1901_s30, 1 }
   0x9   : > { %p1992_p4 = por %p2339_p1, %p45_p0  ;;  %p229_p7 = scmp.lt.s32.totalorder %s1901_s30, 3 }
   0xa   : > { %p1997_p6 = por %p222_p3, %p45_p0  ;;  %s1903_s14 = smov [#allocation5]  }
   0xb   : > { %s2342_s11 = scalar_select %p1992_p4, 1, 0 }
   0xc   : > { %s2343_s12 = scalar_select %p1997_p6, 1, 0 }
   0xd   : > { %p2002_p8 = pnand %p1493_p5, %p229_p7  ;;  %s242_s15 = sshll.u32 %s1903_s14, 4  ;;  %s243_s15 = int_to_ptr.vmem [resolvable:$true] %s242_s15 }
   0xe   : > { %s2010_s16 = sadd.s32 1, %s1901_s30   ;;  %s32_s20 = sadd.s32 1, %s1897_s29 }
   0xf   : > { %s2344_s13 = scalar_select %p2002_p8, 1, 0 }
  0x10   : > { %p1693_p10 = pneg %p2002_p8  ;;  %s29_s18 = ssub.s32 %s1901_s30, %s2010_s16 }
  0x11   : > { %p2020_p12 = scmp.eq.s32.totalorder %s29_s18, 0  ;;  %s1773_s23 = scalar_lea.hbm %s2331_s1, 128 }
  0x12   : > { %p2014_p11 = pnand %p1693_p10, %p2339_p1  ;;  %p1774_p0 = scmp.ne.s32.totalorder %s2331_s1, %s1773_s23 }
  0x13   : > { %s2346_s19 = scalar_select %p2020_p12, 1, 0 }
  0x14   : > { %p1775_p3 = pneg %p2014_p11  ;;  %p1780_p10 = scmp.lt.u32.totalorder %s1773_s23, %s2331_s1 }
  0x16   : > { %p1776_p5 = pnand %p1775_p3, %p1774_p0 }
  0x18   : > { %p1777_p7 = pneg %p1776_p5 }
  0x1a   : > { %p1782_p9 = pnand %p1780_p10, %p1777_p7 }
  0x1c   : > { %1785 = shalt.err (!%p1782_p9)
}
  0x1d   : > { %s1786_s14 = scalar_lea.vmem %s243_s15, 128  ;;  %p1794_p6 = scmp.lt.s32.totalorder %s243_s15, %s243_s15 }
  0x1e   : > { %p1787_p1 = scmp.ne.s32.totalorder %s243_s15, %s1786_s14  ;;  %p1795_p4 = scmp.lt.s32.totalorder %s1786_s14, %s1786_s14 }
  0x20   : > { %p1789_p2 = pnand %p1787_p1, %p1775_p3  ;;  %p1796_p8 = por %p1795_p4, %p1794_p6 }
  0x22   : > { %p1790_p13 = pneg %p1789_p2 }
  0x24   : > { %p1797_p12 = pnand %p1796_p8, %p1790_p13 }
  0x26   : > { %1800 = shalt.err (!%p1797_p12)
}
  0x27   : > { %1696 = dma.hbm_to_vmem [thread:$0]  (!%p2014_p11), %s2331_s1, 128, %s243_s15, [#allocation6]  }
  0x28   : > { %p2347_p1 = scmp.ne.s32.totalorder %s2346_s19, 0  ;;  %p40_p2 = scmp.eq.s32.totalorder %s1901_s30, 0 }
  0x29   : > { %p2348_p4 = scmp.ne.s32.totalorder %s1897_s29, %s1893_s28  ;;  %p2349_p6 = scmp.eq.s32.totalorder %s1983_s9, 1 }
  0x2a   : > { %s2046_s22 = scalar_select %p2347_p1, %s1897_s29, %s32_s20  }
  0x2b   : > { %p2054_p8 = por %p2349_p6, %p2348_p4  ;;  %p1706_p9 = scmp.lt.s32.totalorder %s1901_s30, 2 }
  0x2c   : > { %s271_s23 = sand.u32 1, %s1897_s29   ;;  %p2351_p12 = pmov %p2348_p4 }
  0x2d   : > { %s1496_s24 = sshll.u32 %s271_s23, 3  ;;  %s1497_s25 = sshll.u32 %s1901_s30, 7 }
  0x2e   : > { %p41_p13 = por %p40_p2, %p2351_p12  ;;  %s2067_s15 = scalar_lea.hbm %s2330_s0, %s1497_s25 }
  0x2f   : > { %s275_s19 = scalar_lea.vmem [#allocation2], %s1496_s24  ;;  %s272_s18 = scalar_lea.sflag [#allocation3], %s271_s23 }
  0x30   : > { %s282_s20 = sshll.u32 %s275_s19, 4  ;;  %p2069_p11 = pnand %p1706_p9, %p41_p13  ;;  %s2073_s20 = int_to_ptr.vmem [resolvable:$true] %s282_s20 }
  0x31   : > { %s1801_s21 = scalar_lea.hbm %s2067_s15, 128  ;;  %s1806_s26 = scalar_lea.hbm %s2330_s0, 256 }
  0x32   : > { %p1802_p0 = scmp.ne.s32.totalorder %s2067_s15, %s1801_s21  ;;  %p1803_p3 = pneg %p2069_p11 }
  0x33   : > { %p1807_p10 = scmp.lt.u32.totalorder %s2067_s15, %s2330_s0  ;;  %p1808_p1 = scmp.lt.u32.totalorder %s1806_s26, %s1801_s21 }
  0x34   : > { %p1804_p5 = pnand %p1803_p3, %p1802_p0  ;;  %p1810_p4 = scmp.lt.u32.totalorder %s1801_s21, %s2067_s15 }
  0x35   : > { %p1809_p2 = por %p1808_p1, %p1807_p10 }
  0x36   : > { %p1805_p7 = pneg %p1804_p5 }
  0x37   : > { %p1811_p6 = por %p1810_p4, %p1809_p2 }
  0x39   : > { %p1812_p9 = pnand %p1811_p6, %p1805_p7 }
  0x3b   : > { %1815 = shalt.err (!%p1812_p9)
}
  0x3c   : > { %s1816_s23 = scalar_lea.vmem %s2073_s20, 128  ;;  %s1904_s25 = smov [#allocation2]  }
  0x3d   : > { %p1817_p12 = scmp.ne.s32.totalorder %s2073_s20, %s1816_s23  ;;  %s1821_s24 = sshll.u32 %s1904_s25, 4  ;;  %s1822_s24 = int_to_ptr.vmem [resolvable:$false] %s1821_s24 }
  0x3e   : > { %s1823_s10 = scalar_lea.vmem %s1822_s24, 256  ;;  %p1824_p5 = scmp.lt.s32.totalorder %s2073_s20, %s1822_s24 }
  0x3f   : > { %p1819_p13 = pnand %p1817_p12, %p1803_p3  ;;  %p1825_p10 = scmp.lt.s32.totalorder %s1823_s10, %s1816_s23 }
  0x41   : > { %p1820_p0 = pneg %p1819_p13  ;;  %p1826_p1 = por %p1825_p10, %p1824_p5 }
  0x43   : > { %p1827_p2 = pnand %p1826_p1, %p1820_p0 }
  0x45   : > { %1830 = shalt.err (!%p1827_p2)
}
  0x46   : > { %1700 = dma.hbm_to_vmem [thread:$0]  (!%p2069_p11), %s2067_s15, 128, %s2073_s20, %s272_s18  }
  0x47   : > { %p2353_p7 = scmp.ne.s32.totalorder %s2344_s13, 0 }
  0x48   : > { %s2103_s21 = sand.u32 (!%p2353_p7), 1, %s1893_s28   ;;  %p2354_p3 = scmp.ne.s32.totalorder (!%p2353_p7), %s2342_s11, 0 }
  0x49   : > { %291 = sbr.rel (%p2353_p7) target bundleno = 2689 (0xa81), region = 52  ;;  %s1499_s26 = sshll.u32 (!%p2353_p7), %s2103_s21, 3 }
  0x4a   : > { %s294_s19 = scalar_lea.sflag (!%p2353_p7), [#allocation3], %s2103_s21  ;;  %s297_s23 = scalar_lea.vmem (!%p2353_p7), [#allocation2], %s1499_s26 }
  0x50   : > { %1876 = dma.done.wait (%p2354_p3), %s294_s19, 128  }
  0x51   : > { %1878 = vsyncadd (%p2354_p3), %s294_s19, 4294967168  ;;  %p2355_p11 = scmp.eq.s32.totalorder %s1983_s9, 0 }
  0x53   : > { %1880 = dma.done.wait (%p2355_p11), [#allocation6], 128   ;;  %p2356_p4 = pmov %p2355_p11 }
  0x54   : > { %v1905_v0 = vmov 0.0|0.0   ;;  %vm1906_vm0 = vmmov 0   ;;  %v1907_v1 = vmov 0.0   ;;  %v336_v2 = vld [vmem:[%s2332_s2] sm:$0xff]  ;;  %v337_v3 = vld [vmem:[%s2332_s2 + $0x8] sm:$0xff]  ;;  %v338_v4 = vld [vmem:[%s2332_s2 + $0x10] sm:$0xff] }
  0x55   : > { %1882 = vsyncadd (%p2356_p4), [#allocation6], 4294967168  ;;  %1655 = vmatprep.subr.bf16.mxu1 %v1905_v0  ;;  %1571 = vmatprep.mubr.msk.f32.mxu1 %vm1906_vm0, %v1907_v1  ;;  %v1656_v5 = vpack.c.bf16 %v337_v3, %v336_v2  ;;  %v339_v6 = vld [vmem:[%s2332_s2 + $0x18] sm:$0xff]  ;;  %v2136_v8 = vld [vmem:[%s297_s23] sm:$0xff]  ;;  %vm340_vm1 = vcmask 261120   ;;  %s1908_s10 = smov 104  }
  0x56   : > { %1584 = vmatprep.subr.mxu0 %v1907_v1  ;;  %1586 = vmatprep.mubr.msk.f32.mxu0 %vm1906_vm0, %v1907_v1  ;;  %v1659_v7 = vpack.c.bf16 %v339_v6, %v338_v4  ;;  %s1909_s19 = smov 120   ;;  %s1910_s23 = smov 96   ;;  %vm423_vm2 = vcmask 64512   ;;  %v335_v19 = vld [vmem:[#allocation5] sm:$0xff]  ;;  %vm1095_vm3 = vcmask 130048   ;;  %vm1097_vm4 = vcmask 195584  }
  0x57   : > { %1657 = vmatpush3.bf16.msra.mxu1 %v1656_v5  ;;  %s1911_s11 = smov 112   ;;  %s1912_s13 = smov 64   ;;  %vm1299_vm5 = vcmask 523264  }
  0x58   : > { %1658 = vmatprep.subr.bf16.mxu1 %v1905_v0  ;;  %s1399_s20 = scalar_lea.sflag [#allocation4], %s2103_s21 }
  0x5b   : > { %1660 = vmatpush3.bf16.msra.mxu1 %v1659_v7 }
  0x5c   : > { %1574 = vmatprep.subr.mxu1 %v1907_v1 }
  0x5e   : > { %1572 = vmatmul.mubr.msk.f32.vlgmr.msra.gmra.mrb[0].mxu1 %vm340_vm1, %v2136_v8 }
  0x5f   : > { %1576 = vmatprep.mubr.msk.f32.mxu1 %vm1906_vm0, %v1907_v1 }
 0x131   : > { %v2143_v9 = vpop.f32.mrb[0].mxu1 }
 0x132   : > { %419 = vrot.lane.b32.xlu1 %v2143_v9, %s1908_s10  ;;  %415 = vrot.lane.b32.xlu0 %v2143_v9, %s1909_s19  ;;  %v1573_v10 = vpop.f32.mrb[1].mxu1  ;;  %s1520_s10 = sshll.u32 %s1983_s9, 7  ;;  %s333_s19 = scalar_lea.vmem [#allocation7], %s1499_s26 }
 0x133   : > { %s2285_s15 = scalar_lea.hbm %s2338_s8, %s1520_s10  ;;  %s1916_s9 = smov [#allocation7]  }
 0x134   : > { %s1835_s26 = sshll.u32 %s1916_s9, 4  ;;  %s1836_s26 = int_to_ptr.vmem [resolvable:$false] %s1835_s26 }
 0x135   : > { %s1837_s18 = scalar_lea.vmem %s1836_s26, 256 }
 0x136   : > { %421 = vrot.lane.b32.xlu1 %v2143_v9, %s1910_s23  ;;  %417 = vrot.lane.b32.xlu0 %v2143_v9, %s1911_s11  ;;  %s1914_s11 = smov 24  }
 0x1a4   : > { %v2149_v11 = vpop.permute.xlu1 %419  ;;  %v416_v12 = vpop.permute.xlu0 %415 }
 0x1a5   : > { %498 = vrot.lane.b32.xlu0 %v416_v12, %s1910_s23 }
 0x1a8   : > { %v422_v13 = vpop.permute.xlu1 %421  ;;  %v2151_v14 = vpop.permute.xlu0 %417 }
 0x1a9   : > { %1575 = vmatpush3.xpose.msk.msra.mxu1 %vm423_vm2, %v422_v13  ;;  %650 = vrot.lane.b32.xlu0 %v2149_v11, %s1910_s23 }
 0x1aa   : > { %574 = vrot.lane.b32.xlu1 %v2151_v14, %s1910_s23  ;;  %1579 = vmatprep.subr.mxu1 %v1907_v1  ;;  %s1913_s23 = smov 8  }
 0x1ac   : > { %1577 = vmatmul.mubr.msk.f32.vlgmr.msra.gmra.mrb[2].mxu1 %vm423_vm2, %v2143_v9 }
 0x1ad   : > { %1581 = vmatprep.mubr.msk.f32.mxu1 %vm1906_vm0, %v1907_v1 }
 0x217   : > { %v499_v15 = vpop.permute.xlu0 %498 }
 0x218   : > { %1580 = vmatpush3.xpose.msk.msra.mxu1 %vm423_vm2, %v499_v15  ;;  %v1100_v15 = vld [vmem:[%s2333_s3 + $0x8] sm:$0xff] }
 0x219   : > { %1589 = vmatprep.subr.mxu1 %v1907_v1 }
 0x21b   : > { %1582 = vmatmul.mubr.msk.f32.vlgmr.msra.gmra.mrb[4].mxu1 %vm423_vm2, %v416_v12  ;;  %v651_v16 = vpop.permute.xlu0 %650 }
 0x21c   : > { %v575_v17 = vpop.permute.xlu1 %574  ;;  %1590 = vmatpush3.xpose.msk.msra.mxu1 %vm423_vm2, %v651_v16  ;;  %1591 = vmatprep.mubr.msk.f32.mxu1 %vm1906_vm0, %v1907_v1 }
 0x21d   : > { %1585 = vmatpush3.xpose.msk.msra.mxu0 %vm423_vm2, %v575_v17  ;;  %1599 = vmatprep.subr.mxu1 %v1907_v1 }
 0x21e   : > { %1594 = vmatprep.subr.mxu0 %v1907_v1 }
 0x21f   : > { %1592 = vmatmul.mubr.msk.f32.vlgmr.msra.gmra.mrb[6].mxu1 %vm423_vm2, %v2149_v11 }
 0x220   : > { %1587 = vmatmul.mubr.msk.f32.vlgmr.msra.gmra.mrb[0].mxu0 %vm423_vm2, %v2151_v14  ;;  %1601 = vmatprep.mubr.msk.f32.mxu1 %vm1906_vm0, %v1907_v1 }
 0x221   : > { %1596 = vmatprep.mubr.msk.f32.mxu0 %vm1906_vm0, %v1907_v1 }
 0x27f   : > { %v494_v18 = vpop.f32.mrb[2].mxu1 }
 0x280   : > { %v726_v20 = vmul.f32 0.35355338, %v494_v18  ;;  %v1578_v21 = vpop.f32.mrb[3].mxu1 }
 0x282   : > { %v730_v22 = vadd.f32 %v726_v20, %v335_v19  ;;  %v1102_v20 = vld [vmem:[%s2333_s3 + $0x18] sm:$0xff] }
 0x284   : > { %v734_v23 = vsel %vm423_vm2, %v730_v22, -inf }
 0x285   : > { %735 = vmax.xlane.f32.xlu1 %v734_v23 }
 0x2ee   : > { %v570_v24 = vpop.f32.mrb[4].mxu1 }
 0x2ef   : > { %v727_v25 = vmul.f32 0.35355338, %v570_v24  ;;  %v1583_v26 = vpop.f32.mrb[5].mxu1 }
 0x2f1   : > { %v731_v27 = vadd.f32 %v727_v25, %v335_v19 }
 0x2f2   : > { %v722_v28 = vpop.f32.mrb[6].mxu1 }
 0x2f3   : > { %v646_v29 = vpop.f32.mrb[0].mxu0  ;;  %v729_v30 = vmul.f32 0.35355338, %v722_v28  ;;  %v1593_v31 = vpop.f32.mrb[7].mxu1  ;;  %v737_v32 = vsel %vm423_vm2, %v731_v27, -inf }
 0x2f4   : > { %v728_v33 = vmul.f32 0.35355338, %v646_v29  ;;  %v1588_v34 = vpop.f32.mrb[1].mxu0  ;;  %738 = vmax.xlane.f32.xlu0 %v737_v32 }
 0x2f5   : > { %v733_v35 = vadd.f32 %v729_v30, %v335_v19 }
 0x2f6   : > { %v732_v36 = vadd.f32 %v728_v33, %v335_v19  ;;  %v1101_v19 = vld [vmem:[%s2333_s3 + $0x10] sm:$0xff] }
 0x2f7   : > { %v743_v37 = vsel %vm423_vm2, %v733_v35, -inf  ;;  %v1665_v21 = vpack.c.bf16 %v1102_v20, %v1101_v19 }
 0x2f8   : > { %v740_v38 = vsel %vm423_vm2, %v732_v36, -inf  ;;  %744 = vmax.xlane.f32.xlu1 %v743_v37 }
 0x2f9   : > { %741 = vmax.xlane.f32.xlu0 %v740_v38 }
 0x309   : > { %854 = vrot.lane.b32.xlu1 %v416_v12, %s1912_s13 }
 0x30f   : > { %778 = vrot.lane.b32.xlu0 %v2143_v9, %s1912_s13 }
 0x312   : > { %v736_v39 = vpop.xlane.xlu1 %735 }
 0x313   : > { %v746_v40 = vsub.f32 %v730_v22, %v736_v39 }
 0x315   : > { %v750_v41 = vmul.f32 1.442695, %v746_v40 }
 0x317   : > { %1753 = vpow2.f32 %v750_v41 }
 0x321   : > { %v1754_v42 = vpop.eup %1753 }
 0x322   : > { %v758_v43 = vsel %vm423_vm2, %v1754_v42, 0.0 }
 0x32e   : > { %759 = vadd.xlane.f32.xlu0 %v758_v43  ;;  %v1202_v43 = vld [vmem:[%s2334_s4] sm:$0xff] }
 0x381   : > { %v739_v44 = vpop.xlane.xlu0 %738 }
 0x382   : > { %v747_v45 = vsub.f32 %v731_v27, %v739_v44  ;;  %v1204_v44 = vld [vmem:[%s2334_s4 + $0x10] sm:$0xff] }
 0x384   : > { %v752_v46 = vmul.f32 1.442695, %v747_v45  ;;  %v1205_v45 = vld [vmem:[%s2334_s4 + $0x18] sm:$0xff] }
 0x385   : > { %v745_v47 = vpop.xlane.xlu1 %744 }
 0x386   : > { %1755 = vpow2.f32 %v752_v46  ;;  %v742_v48 = vpop.xlane.xlu0 %741  ;;  %v749_v49 = vsub.f32 %v733_v35, %v745_v47  ;;  %v1671_v46 = vpack.c.bf16 %v1205_v45, %v1204_v44  ;;  %v1287_v47 = vld [vmem:[%s2336_s6] sm:$0xff] }
 0x387   : > { %v748_v50 = vsub.f32 %v732_v36, %v742_v48  ;;  %v1288_v48 = vld [vmem:[%s2336_s6 + $0x8] sm:$0xff] }
 0x388   : > { %v756_v51 = vmul.f32 1.442695, %v749_v49  ;;  %v1289_v49 = vld [vmem:[%s2336_s6 + $0x10] sm:$0xff] }
 0x389   : > { %v754_v52 = vmul.f32 1.442695, %v748_v50  ;;  %v855_v53 = vpop.permute.xlu1 %854  ;;  %v1674_v50 = vpack.c.bf16 %v1288_v48, %v1287_v47 }
 0x38a   : > { %1757 = vpow2.f32 %v756_v51  ;;  %v779_v54 = vpop.permute.xlu0 %778  ;;  %1600 = vmatpush3.msra.mxu1 %v855_v53  ;;  %v1290_v51 = vld [vmem:[%s2336_s6 + $0x18] sm:$0xff]  ;;  %v1291_v53 = vld [vmem:[%s2336_s6 + $0x20] sm:$0xff] }
 0x38b   : > { %1759 = vpow2.f32 %v754_v52  ;;  %1595 = vmatpush3.msra.mxu0 %v779_v54  ;;  %1609 = vmatprep.subr.mxu1 %v1907_v1  ;;  %v1677_v52 = vpack.c.bf16 %v1290_v51, %v1289_v49  ;;  %v1292_v54 = vld [vmem:[%s2336_s6 + $0x28] sm:$0xff] }
 0x38c   : > { %1604 = vmatprep.subr.mxu0 %v1907_v1 }
 0x390   : > { %v1756_v55 = vpop.eup %1755 }
 0x391   : > { %v761_v56 = vsel %vm423_vm2, %v1756_v55, 0.0 }
 0x392   : > { %762 = vadd.xlane.f32.xlu1 %v761_v56 }
 0x394   : > { %v1758_v57 = vpop.eup %1757 }
 0x395   : > { %v1760_v58 = vpop.eup %1759  ;;  %v767_v59 = vsel %vm423_vm2, %v1758_v57, 0.0 }
 0x396   : > { %v764_v60 = vsel %vm423_vm2, %v1760_v58, 0.0  ;;  %768 = vadd.xlane.f32.xlu1 %v767_v59 }
 0x397   : > { %765 = vadd.xlane.f32.xlu0 %v764_v60 }
 0x3a7   : > { %930 = vrot.lane.b32.xlu1 %v2151_v14, %s1912_s13  ;;  %v1099_v14 = vld [vmem:[%s2333_s3] sm:$0xff] }
 0x3a8   : > { %v1662_v16 = vpack.c.bf16 %v1100_v15, %v1099_v14 }
 0x3ad   : > { %1006 = vrot.lane.b32.xlu0 %v2149_v11, %s1912_s13  ;;  %s1915_s13 = smov 16  }
 0x3bb   : > { %v760_v61 = vpop.xlane.xlu0 %759 }
 0x3bc   : > { %1761 = vrcp.f32 %v760_v61 }
 0x3c6   : > { %v1762_v62 = vpop.eup %1761 }
 0x3c7   : > { %v774_v63 = vmul.f32 %v1762_v62, %v1754_v42  ;;  %v1176_v62 = vld [vmem:[%s2337_s7] sm:$0xff] }
 0x3c9   : > { %1597 = vmatmul.mubr.msk.f32.vlgmr.msra.gmra.mrb[2].mxu0 %vm423_vm2, %v774_v63 }
 0x3ca   : > { %1606 = vmatprep.mubr.msk.f32.mxu0 %vm1906_vm0, %v1907_v1 }
 0x41f   : > { %v763_v2 = vpop.xlane.xlu1 %762 }
 0x420   : > { %1763 = vrcp.f32 %v763_v2 }
 0x423   : > { %v769_v3 = vpop.xlane.xlu1 %768 }
 0x424   : > { %v766_v4 = vpop.xlane.xlu0 %765  ;;  %1765 = vrcp.f32 %v769_v3 }
 0x425   : > { %1767 = vrcp.f32 %v766_v4 }
 0x427   : > { %v931_v5 = vpop.permute.xlu1 %930 }
 0x428   : > { %1605 = vmatpush3.msra.mxu0 %v931_v5  ;;  %v1007_v9 = vpop.permute.xlu0 %1006 }
 0x429   : > { %1661 = vmatprep.subr.bf16.mxu0 %v1905_v0 }
 0x42a   : > { %v1764_v6 = vpop.eup %1763 }
 0x42b   : > { %v775_v7 = vmul.f32 %v1764_v6, %v1756_v55  ;;  %v1680_v55 = vpack.c.bf16 %v1292_v54, %v1291_v53 }
 0x42d   : > { %1602 = vmatmul.mubr.msk.f32.vlgmr.msra.gmra.mrb[8].mxu1 %vm423_vm2, %v775_v7 }
 0x42e   : > { %v1766_v10 = vpop.eup %1765  ;;  %1610 = vmatpush3.msra.mxu1 %v1007_v9  ;;  %1611 = vmatprep.mubr.msk.f32.mxu1 %vm1906_vm0, %v1907_v1  ;;  %v1294_v9 = vld [vmem:[%s2336_s6 + $0x38] sm:$0xff] }
 0x42f   : > { %v1768_v11 = vpop.eup %1767  ;;  %v777_v12 = vmul.f32 %v1766_v10, %v1758_v57  ;;  %1667 = vmatprep.subr.bf16.mxu1 %v1905_v0 }
 0x430   : > { %v776_v13 = vmul.f32 %v1768_v11, %v1760_v58  ;;  %v1192_v58 = vlaneseq  ;;  %v1516_v11 = vld [vmem:[%s2335_s5] ss:$0 sm:$0xff] }
 0x431   : > { %1612 = vmatmul.mubr.msk.f32.vlgmr.msra.gmra.mrb[10].mxu1 %vm423_vm2, %v777_v12 }
 0x432   : > { %1607 = vmatmul.mubr.msk.f32.vlgmr.msra.gmra.mrb[4].mxu0 %vm423_vm2, %v776_v13  ;;  %1633 = vmatprep.mubr.msk.f32.mxu1 %vm1906_vm0, %v1907_v1  ;;  %v1193_v60 = vshrl.u32 %v1192_v58, 7 }
 0x433   : > { %1622 = vmatprep.mubr.msk.f32.mxu0 %vm1906_vm0, %v1907_v1  ;;  %1663 = vmatpush3.bf16.msra.mxu0 %v1662_v16 }
 0x434   : > { %1664 = vmatprep.subr.bf16.mxu0 %v1905_v0  ;;  %v1194_v61 = vsub.s32 0, %v1193_v60  ;;  %v1199_v63 = vsub.s32 1, %v1193_v60  ;;  %v1297_v16 = vsub.s32 4, %v1193_v60 }
 0x436   : > { %v1195_v2 = vrot.slane %v1176_v62, %v1194_v61  ;;  %v1200_v5 = vrot.slane %v1176_v62, %v1199_v63 }
 0x437   : > { %1666 = vmatpush3.bf16.msra.mxu0 %v1665_v21 }
 0x438   : > { %1673 = vmatprep.subr.bf16.mxu0 %v1905_v0 }
 0x49c   : > { %v850_v17 = vpop.f32.mrb[2].mxu0 }
 0x49d   : > { %v1598_v18 = vpop.f32.mrb[3].mxu0 }
 0x500   : > { %v926_v22 = vpop.f32.mrb[8].mxu1 }
 0x501   : > { %1083 = vrot.lane.b32.xlu1 %v926_v22, %s1913_s23  ;;  %v1603_v23 = vpop.f32.mrb[9].mxu1  ;;  %s1412_s23 = sshll.u32 %s333_s19, 4  ;;  %s2287_s23 = int_to_ptr.vmem [resolvable:$true] %s1412_s23 }
 0x502   : > { %s1831_s14 = scalar_lea.vmem %s2287_s23, 128  ;;  %p1838_p13 = scmp.lt.s32.totalorder %s2287_s23, %s1836_s26 }
 0x503   : > { %p1832_p6 = scmp.ne.s32.totalorder %s2287_s23, %s1831_s14  ;;  %p1839_p0 = scmp.lt.s32.totalorder %s1837_s18, %s1831_s14 }
 0x504   : > { %v1078_v24 = vpop.f32.mrb[10].mxu1 }
 0x505   : > { %v1002_v25 = vpop.f32.mrb[4].mxu0  ;;  %1091 = vrot.lane.b32.xlu1 %v1078_v24, %s1914_s11  ;;  %v1613_v26 = vpop.f32.mrb[11].mxu1  ;;  %p1833_p9 = pnand %p1832_p6, %p2054_p8  ;;  %p1840_p5 = por %p1839_p0, %p1838_p13 }
 0x506   : > { %1087 = vrot.lane.b32.xlu0 %v1002_v25, %s1915_s13  ;;  %v1608_v27 = vpop.f32.mrb[5].mxu0 }
 0x507   : > { %p1834_p12 = pneg %p1833_p9 }
 0x509   : > { %p1841_p10 = pnand %p1840_p5, %p1834_p12 }
 0x573   : > { %v1084_v28 = vpop.permute.xlu1 %1083 }
 0x574   : > { %v1094_v30 = vsel %vm423_vm2, %v850_v17, %v1084_v28  ;;  %v1298_v17 = vrot.slane %v1176_v62, %v1297_v16 }
 0x577   : > { %v1092_v29 = vpop.permute.xlu1 %1091 }
 0x578   : > { %v1088_v31 = vpop.permute.xlu0 %1087 }
 0x579   : > { %v1096_v32 = vsel %vm1095_vm3, %v1094_v30, %v1088_v31  ;;  %v1389_v31 = vsub.s32 2, %v1193_v60 }
 0x57a   : > { %v1098_v33 = vsel %vm1097_vm4, %v1096_v32, %v1092_v29  ;;  %v1394_v32 = vsub.s32 3, %v1193_v60 }
 0x57b   : > { %1623 = vmatmul.mubr.msk.f32.vlgmr.msra.gmra.mrb[6].mxu0 %vm340_vm1, %v1098_v33  ;;  %v1390_v33 = vrot.slane %v1176_v62, %v1389_v31 }
 0x57c   : > { %1652 = vmatprep.mubr.msk.f32.mxu0 %vm1906_vm0, %v1907_v1  ;;  %v1203_v1 = vld [vmem:[%s2334_s4 + $0x8] sm:$0xff]  ;;  %1675 = vmatpush3.bf16.msra.mxu0 %v1674_v50 }
 0x57d   : > { %1676 = vmatprep.subr.bf16.mxu0 %v1905_v0 }
 0x580   : > { %1678 = vmatpush3.bf16.msra.mxu0 %v1677_v52 }
 0x581   : > { %1679 = vmatprep.subr.bf16.mxu0 %v1905_v0 }
 0x584   : > { %1681 = vmatpush3.bf16.msra.mxu0 %v1680_v55 }
 0x585   : > { %1682 = vmatprep.subr.bf16.mxu0 %v1905_v0 }
 0x64e   : > { %v1172_v34 = vpop.f32.mrb[6].mxu0 }
 0x64f   : > { %v1177_v35 = vadd.f32 %v1172_v34, %v2136_v8  ;;  %v1624_v36 = vpop.f32.mrb[7].mxu0  ;;  %v1668_v8 = vpack.c.bf16 %v1203_v1, %v1202_v43 }
 0x650   : > { %v1395_v36 = vrot.slane %v1176_v62, %v1394_v32 }
 0x651   : > { %v1178_v37 = vsel %vm340_vm1, %v1177_v35, 0.0  ;;  %1669 = vmatpush3.bf16.msra.mxu1 %v1668_v8 }
 0x652   : > { %1179 = vadd.xlane.f32.xlu0 %v1178_v37  ;;  %1670 = vmatprep.subr.bf16.mxu1 %v1905_v0  ;;  %v1293_v0 = vld [vmem:[%s2336_s6 + $0x30] sm:$0xff] }
 0x653   : > { %v1683_v10 = vpack.c.bf16 %v1294_v9, %v1293_v0 }
 0x655   : > { %1672 = vmatpush3.bf16.msra.mxu1 %v1671_v46  ;;  %1684 = vmatpush3.bf16.msra.mxu0 %v1683_v10 }
 0x6df   : > { %v1180_v38 = vpop.xlane.xlu0 %1179 }
 0x6e0   : > { %v1182_v39 = vmul.f32 0.03125, %v1180_v38 }
 0x6e2   : > { %v1183_v40 = vsub.f32 %v1177_v35, %v1182_v39 }
 0x6e4   : > { %v1184_v41 = vmul.f32 %v1183_v40, %v1183_v40 }
 0x6e6   : > { %v1185_v42 = vsel %vm340_vm1, %v1184_v41, 0.0 }
 0x6e7   : > { %1186 = vadd.xlane.f32.xlu1 %v1185_v42 }
 0x774   : > { %v1187_v56 = vpop.xlane.xlu1 %1186 }
 0x775   : > { %v1188_v57 = vmul.f32 0.03125, %v1187_v56 }
 0x777   : > { %v1189_v59 = vadd.f32 1e-05, %v1188_v57 }
 0x779   : > { %1769 = vrsqrt.f32 %v1189_v59 }
 0x783   : > { %v1770_v3 = vpop.eup %1769 }
 0x784   : > { %v1191_v4 = vmul.f32 %v1770_v3, %v1183_v40 }
 0x786   : > { %v1196_v6 = vmul.f32 %v1195_v2, %v1191_v4 }
 0x788   : > { %v1201_v7 = vadd.f32 %v1200_v5, %v1196_v6 }
 0x78a   : > { %1634 = vmatmul.mubr.msk.f32.vlgmr.msra.gmra.mrb[12].mxu1 %vm340_vm1, %v1201_v7 }
 0x85d   : > { %v1282_v12 = vpop.f32.mrb[12].mxu1 }
 0x85e   : > { %v1283_v13 = vadd.f32 %v1516_v11, %v1282_v12  ;;  %v1635_v14 = vpop.f32.mrb[13].mxu1 }
 0x860   : > { %v1286_v15 = vmax.f32 %v1283_v13, 0.0 }
 0x862   : > { %1653 = vmatmul.mubr.msk.f32.vlgmr.msra.gmra.mrb[8].mxu0 %vm1299_vm5, %v1286_v15 }
 0x935   : > { %v1369_v18 = vpop.f32.mrb[8].mxu0 }
 0x936   : > { %v1370_v19 = vadd.f32 %v1369_v18, %v1298_v17  ;;  %v1654_v20 = vpop.f32.mrb[9].mxu0 }
 0x938   : > { %v1373_v21 = vadd.f32 %v1370_v19, %v1201_v7 }
 0x93a   : > { %v1374_v22 = vsel %vm340_vm1, %v1373_v21, 0.0 }
 0x93b   : > { %1375 = vadd.xlane.f32.xlu0 %v1374_v22 }
 0x9c8   : > { %v1376_v23 = vpop.xlane.xlu0 %1375 }
 0x9c9   : > { %v1377_v24 = vmul.f32 0.03125, %v1376_v23 }
 0x9cb   : > { %v1378_v25 = vsub.f32 %v1373_v21, %v1377_v24 }
 0x9cd   : > { %v1379_v26 = vmul.f32 %v1378_v25, %v1378_v25 }
 0x9cf   : > { %v1380_v27 = vsel %vm340_vm1, %v1379_v26, 0.0 }
 0x9d0   : > { %1381 = vadd.xlane.f32.xlu0 %v1380_v27 }
 0xa5d   : > { %v1382_v28 = vpop.xlane.xlu0 %1381 }
 0xa5e   : > { %v1383_v29 = vmul.f32 0.03125, %v1382_v28 }
 0xa60   : > { %v1384_v30 = vadd.f32 1e-05, %v1383_v29 }
 0xa62   : > { %1771 = vrsqrt.f32 %v1384_v30 }
 0xa6c   : > { %v1772_v34 = vpop.eup %1771 }
 0xa6d   : > { %v1386_v35 = vmul.f32 %v1772_v34, %v1378_v25 }
 0xa6f   : > { %v1391_v37 = vmul.f32 %v1390_v33, %v1386_v35 }
 0xa71   : > { %v1396_v38 = vadd.f32 %v1395_v36, %v1391_v37 }
 0xa73   : > { %1397 = vst.msk [vmem:[%s333_s19] sm:$0xff] %vm340_vm1, %v1396_v38 }
 0xa74   : > { %1844 = shalt.err (!%p1841_p10)
}
 0xa75   : > { %s1845_s21 = scalar_lea.hbm %s2285_s15, 128  ;;  %s1849_s10 = scalar_lea.hbm %s2338_s8, 256 }
 0xa76   : > { %p1846_p1 = scmp.ne.s32.totalorder %s2285_s15, %s1845_s21  ;;  %p1850_p3 = scmp.lt.u32.totalorder %s2285_s15, %s2338_s8 }
 0xa77   : > { %p1851_p11 = scmp.lt.u32.totalorder %s1849_s10, %s1845_s21  ;;  %p1853_p6 = scmp.lt.u32.totalorder %s1845_s21, %s2285_s15 }
 0xa78   : > { %p1847_p2 = pnand %p1846_p1, %p2054_p8 }
 0xa79   : > { %p1852_p4 = por %p1851_p11, %p1850_p3 }
 0xa7a   : > { %p1848_p7 = pneg %p1847_p2 }
 0xa7b   : > { %p1854_p9 = por %p1853_p6, %p1852_p4 }
 0xa7d   : > { %p1855_p12 = pnand %p1854_p9, %p1848_p7 }
 0xa7f   : > { %1858 = shalt.err (!%p1855_p12)
}
 0xa80   : > { %1691 = dma.vmem_to_hbm [thread:$0]  (%p2054_p8), %s2287_s23, 128, %s2285_s15, %s1399_s20  }
 0xa81 PF: > { %s1424_s13 = sand.u32 1, %s1889_s27   ;;  %p2357_p13 = scmp.ne.s32.totalorder %s2343_s12, 0 }
 0xa82   : > { %p2358_p0 = scmp.ge.s32.totalorder %s1901_s30, 2  ;;  %s1425_s14 = scalar_lea.sflag [#allocation4], %s1424_s13 }
 0xa84   : > { %p1702_p5 = pnand %p2358_p0, %p2357_p13 }
 0xa86   : > { %1884 = dma.done.wait (!%p1702_p5), %s1425_s14, 128  }
 0xa87   : > { %1886 = vsyncadd (!%p1702_p5), %s1425_s14, 4294967168  ;;  %p22_p10 = scmp.ge.s32.totalorder %s2010_s16, 4   ;;  %s2359_s27 = smov %s1893_s28 }
 0xa88   : > { %s2360_s28 = smov %s1897_s29  ;;  %s2361_s29 = smov %s2046_s22 }
 0xa89   : > { %s2362_s30 = smov %s2010_s16  ;;  %24 = sbr.rel (!%p22_p10) target bundleno = 6 (0x6), region = 101 }
 0xa90   :  { %1430 = vsyncpa [#allocation3], 1 }
 0xa91   :  { %1432 = vsyncpa [#allocation3 + $0x1], 1 }
 0xa92   :  { %1433 = vsyncpa [#allocation6], 1 }
 0xa93   :  { %1434 = vsyncpa [#allocation4], 1 }
 0xa94   :  { %1436 = vsyncpa [#allocation4 + $0x1], 1 }

</bundles_post_ra>
